<compile_context>
chip_gen: v7x
topology: tpu7x:2x2x1
jax: 0.10.0
libtpu: 0.0.40
codegen_flags: <defaults>
</compile_context>

<pallas_src>
import functools

import jax
import jax.numpy as jnp
from jax.experimental import pallas as pl
from jax.experimental.pallas import tpu as pltpu

_TARGET_TILE_BYTES = 8 << 20   # resids bytes per pipeline buffer
_VMEM_CAP_BYTES = 56 << 20     # stay well under v7x's 64 MiB physical VMEM


def _round_up(x: int, m: int) -> int:
    return ((x + m - 1) // m) * m


def _vmem_needed(tb: int, d_model: int, itemsize: int) -> int:
    """Double-buffered VMEM working set for one grid step (padded layouts)."""
    d_lanes = _round_up(d_model, 128)
    x_tile = 2 * tb * d_lanes * itemsize            # resids tile, double buffered
    o_tile = 2 * tb * 128 * 4                       # (tb, 1) output, lane padded
    w_col = 2 * _round_up(d_model, 8) * 128 * 4     # (d_model, 1) column, lane padded
    return x_tile + o_tile + w_col


def _choose_tb(batch: int, d_model: int, itemsize: int) -> int:
    """Batch tile: ~_TARGET_TILE_BYTES per buffer, multiple of 8, >= 2 grid
    steps whenever the batch allows it, and within the VMEM cap."""
    batch_padded = _round_up(batch, 8)
    rows = _TARGET_TILE_BYTES // (_round_up(d_model, 128) * itemsize)
    tb = max(8, (rows // 8) * 8)
    tb = min(tb, batch_padded)
    # Keep >= 2 grid steps so both v7x TensorCores can stream HBM.
    if batch_padded >= 16:
        tb = min(tb, _round_up(pl.cdiv(batch_padded, 2), 8))
    # Shrink until the double-buffered working set fits the VMEM cap.
    while tb > 8 and _vmem_needed(tb, d_model, itemsize) + (2 << 20) > _VMEM_CAP_BYTES:
        tb = max(8, ((tb // 2) // 8) * 8)
    return tb


def _probe_kernel(b_ref, w_ref, x_ref, o_ref):
    # b_ref: (1,)           SMEM scalar bias
    # w_ref: (d_model, 1)   VMEM column (constant index_map -> fetched once)
    # x_ref: (tb, d_model)  VMEM batch tile
    # o_ref: (tb, 1)
    acc = jnp.dot(x_ref[...], w_ref[...], preferred_element_type=jnp.float32)
    o_ref[...] = (acc + b_ref[0]).astype(o_ref.dtype)


@functools.partial(jax.jit, static_argnames=("tb",))
def linear_probe_forward(w, b, resids, *, tb=None):
    """Pallas implementation of LinearProbe.forward.

    w:      (d_model,) float32
    b:      (1,)       float32
    resids: (batch, d_model) float32 (or bfloat16)
    returns (batch,)
    """
    batch, d_model = resids.shape
    itemsize = jnp.dtype(resids.dtype).itemsize
    if tb is None:
        tb = _choose_tb(batch, d_model, itemsize)

    # Pad the batch so it divides evenly into tiles; padded rows produce `b`
    # only and are sliced away below.
    padded = pl.cdiv(batch, tb) * tb
    x = resids if padded == batch else jnp.pad(resids, ((0, padded - batch), (0, 0)))

    w_col = w.reshape(d_model, 1)
    out_dtype = jnp.result_type(resids.dtype, w.dtype)

    vmem_needed = _vmem_needed(tb, d_model, itemsize)
    vmem_limit = min(max(vmem_needed + (2 << 20), 32 << 20), _VMEM_CAP_BYTES)
    vmem_limit = max(vmem_limit, vmem_needed + (1 << 20))  # never clamp below need

    out = pl.pallas_call(
        _probe_kernel,
        out_shape=jax.ShapeDtypeStruct((padded, 1), out_dtype),
        grid=(padded // tb,),
        in_specs=[
            pl.BlockSpec(memory_space=pltpu.MemorySpace.SMEM),   # bias scalar
            pl.BlockSpec((d_model, 1), lambda i: (0, 0)),        # w column (replicated)
            pl.BlockSpec((tb, d_model), lambda i: (i, 0)),       # resids tile
        ],
        out_specs=pl.BlockSpec((tb, 1), lambda i: (i, 0)),
        compiler_params=pltpu.CompilerParams(
            dimension_semantics=("parallel",),
            vmem_limit_bytes=int(vmem_limit),
        ),
    )(b, w_col, x)

    return out[:batch, 0]


def init_linear_probe_params(d_model, weight_init_range, weight_init_seed):
    """Deterministic parameter init mirroring LinearProbe.__init__:
       w = randn(d_model) * weight_init_range ; b = zeros(1)."""
    key = jax.random.PRNGKey(weight_init_seed)
    w = jax.random.normal(key, (d_model,), dtype=jnp.float32) * weight_init_range
    b = jnp.zeros((1,), dtype=jnp.float32)
    return w, b


if __name__ == "__main__":
    # Small shapes consistent with the forward; batch deliberately not a
    # multiple of 8 to exercise the padding path and the >=2-step grid.
    d_model = 256
    batch = 12
    weight_init_range = 0.02
    weight_init_seed = 0

    w, b = init_linear_probe_params(d_model, weight_init_range, weight_init_seed)

    key = jax.random.PRNGKey(0)
    resids = jax.random.normal(key, (batch, d_model), dtype=jnp.float32)

    out = linear_probe_forward(w, b, resids)
    out = jax.block_until_ready(out)

    # Pure-JAX reference: w @ resids.T + b  -> (batch,)
    ref = jnp.matmul(w, resids.T, precision=jax.lax.Precision.HIGHEST) + b
    assert out.shape == (batch,), out.shape
    assert jnp.allclose(out, ref, atol=1e-4, rtol=1e-4), (out, ref)

    print("KERNEL_OK")
</pallas_src>

<mosaic_0001>
module attributes {stable_mosaic.version = 11 : i64} {
  func.func @_probe_kernel(%arg0: i32, %arg1: memref<1xf32, #tpu.memory_space<smem>>, %arg2: memref<256x1xf32, #tpu.memory_space<vmem>>, %arg3: memref<8x256xf32, #tpu.memory_space<vmem>>, %arg4: memref<8x1xf32, #tpu.memory_space<vmem>>) attributes {dimension_semantics = [#tpu.dimension_semantics<parallel>], iteration_bounds = array<i64: 2>, scalar_prefetch = 0 : i64, scratch_operands = 0 : i64, tpu.core_type = #tpu.core_type<tc>, window_params = [{transform_indices = @transform_0, window_bounds = array<i64: 1>}, {pipeline_mode = #tpu.pipeline_mode<synchronous>, transform_indices = @transform_1, window_bounds = array<i64: 256, 1>}, {transform_indices = @transform_2, window_bounds = array<i64: 8, 256>}, {transform_indices = @transform_3, window_bounds = array<i64: 8, 1>}]} {
    %c0 = arith.constant 0 : index
    %c0_0 = arith.constant 0 : index
    %0 = vector.load %arg3[%c0, %c0_0] : memref<8x256xf32, #tpu.memory_space<vmem>>, vector<8x256xf32>
    %c0_1 = arith.constant 0 : index
    %c0_2 = arith.constant 0 : index
    %1 = vector.load %arg2[%c0_1, %c0_2] : memref<256x1xf32, #tpu.memory_space<vmem>>, vector<256x1xf32>
    %cst = arith.constant dense<0.000000e+00> : vector<8x1xf32>
    %2 = tpu.matmul %0, %1, %cst {dimension_numbers = #tpu.dot_dimension_numbers<[1], [0], [0], [1], [0, 0, 1, 1], [], []>} : vector<8x256xf32>, vector<256x1xf32>, vector<8x1xf32> -> vector<8x1xf32>
    %c0_3 = arith.constant 0 : index
    %3 = memref.load %arg1[%c0_3] : memref<1xf32, #tpu.memory_space<smem>>
    %4 = vector.broadcast %3 : f32 to vector<8x1xf32>
    %5 = arith.addf %2, %4 : vector<8x1xf32>
    %c0_4 = arith.constant 0 : index
    %c0_5 = arith.constant 0 : index
    %6 = vector.load %arg4[%c0_4, %c0_5] : memref<8x1xf32, #tpu.memory_space<vmem>>, vector<8x1xf32>
    tpu.vector_store %arg4[%c0_4, %c0_5], %5 {strides = array<i32>} : memref<8x1xf32, #tpu.memory_space<vmem>>, vector<8x1xf32>,
    return
  }
  func.func @transform_0(%arg0: i32) -> i32 {
    %c0_i32 = arith.constant 0 : i32
    %c0_i32_0 = arith.constant 0 : i32
    return %c0_i32 : i32
  }
  func.func @transform_1(%arg0: i32) -> (i32, i32) {
    %c0_i32 = arith.constant 0 : i32
    %c0_i32_0 = arith.constant 0 : i32
    %c0_i32_1 = arith.constant 0 : i32
    return %c0_i32, %c0_i32_0 : i32, i32
  }
  func.func @transform_2(%arg0: i32) -> (i32, i32) {
    %c0_i32 = arith.constant 0 : i32
    %c0_i32_0 = arith.constant 0 : i32
    return %arg0, %c0_i32 : i32, i32
  }
  func.func @transform_3(%arg0: i32) -> (i32, i32) {
    %c0_i32 = arith.constant 0 : i32
    %c0_i32_0 = arith.constant 0 : i32
    return %arg0, %c0_i32 : i32, i32
  }
}

</mosaic_0001>

<bundles_post_ra>
// kernel: linear_probe_forward.1
= control target key start
LH: loop header
LB: loop body
LE: loop exit
PB: predicated region body
PF: predicated region fallthrough
CT: control target
= control target key end

     0   :  { %s448_s14 = smov 0   ;;  %s569_s0 = inlined_call_operand.<no memory space> [shape: f32[1], index: 0, kind: input, shape index: {}]   ;;  %s570_s1 = inlined_call_operand.vmem [shape: f32[256,1], index: 1, kind: input, shape index: {}]   ;;  %s571_s2 = inlined_call_operand.vmem [shape: f32[16,256], index: 2, kind: input, shape index: {}]   ;;  %s572_s3 = inlined_call_operand.vmem [shape: f32[16,1], index: 3, kind: output, shape index: {}]  }
   0x1   :  { %8 = sst [smem:[#allocation2]] %s569_s0 }
   0x2 LB: > { %s331_s15 = sadd.s32 4294967295, %s423_s14   ;;  %p335_p0 = scmp.ge.s32.totalorder %s423_s14, 1  ;;  %s423_s14 = sphi %s448_s14, %s14_s14  }
   0x3   : > { %p138_p1 = scmp.lt.s32.totalorder %s423_s14, 3 }
   0x5   : > { %p139_p2 = pnand %p335_p0, %p138_p1 }
   0x6   : > { %v188_v0 = vld [vmem:[%s570_s1 + $0x80] sm:$0xff] (!%p139_p2)  ;;  %v189_v1 = vld [vmem:[%s570_s1 + $0x88] sm:$0xff] (!%p139_p2)  ;;  %p161_p3 = scmp.lt.s32.totalorder (!%p139_p2), %s331_s15, 1  ;;  %v190_v5 = vld [vmem:[%s570_s1 + $0x90] sm:$0xff] (!%p139_p2)  ;;  %s204_s5 = sld [smem:[#allocation2]] (!%p139_p2)  ;;  %vm276_vm0 = vcmask (!%p139_p2), 7168  }
   0x7   : > { %142 = sbr.rel (%p139_p2) target bundleno = 259 (0x103), region = 32  ;;  %v172_v2 = vld [vmem:[%s570_s1] sm:$0xff] (!%p139_p2)  ;;  %v377_v3 = vpack.c.bf16 (!%p139_p2), %v189_v1, %v188_v0  ;;  %v173_v4 = vld [vmem:[%s570_s1 + $0x8] sm:$0xff] (!%p139_p2)  ;;  %v191_v6 = vld [vmem:[%s570_s1 + $0x98] sm:$0xff] (!%p139_p2) }
   0x8   : > { %v379_v7 = vpack.c.bf16 (!%p139_p2), %v173_v4, %v172_v2  ;;  %v381_v8 = vpack.c.bf16 (!%p139_p2), %v191_v6, %v190_v5  ;;  %v174_v9 = vld [vmem:[%s570_s1 + $0x10] sm:$0xff] (!%p139_p2)  ;;  %v175_v10 = vld [vmem:[%s570_s1 + $0x18] sm:$0xff] (!%p139_p2)  ;;  %v192_v11 = vld [vmem:[%s570_s1 + $0xa0] sm:$0xff] (!%p139_p2) }
   0x9   : > { %378 = vmatprep.subr.bf16.mxu0 (!%p139_p2), %v377_v3  ;;  %v193_v12 = vld [vmem:[%s570_s1 + $0xa8] sm:$0xff] (!%p139_p2)  ;;  %v383_v13 = vpack.c.bf16 (!%p139_p2), %v175_v10, %v174_v9  ;;  %v176_v15 = vld [vmem:[%s570_s1 + $0x20] sm:$0xff] (!%p139_p2)  ;;  %v194_v17 = vld [vmem:[%s570_s1 + $0xb0] sm:$0xff] (!%p139_p2) }
   0xa   : > { %380 = vmatpush3.bf16.msra.mxu0 (!%p139_p2), %v379_v7  ;;  %v385_v14 = vpack.c.bf16 (!%p139_p2), %v193_v12, %v192_v11  ;;  %v177_v16 = vld [vmem:[%s570_s1 + $0x28] sm:$0xff] (!%p139_p2)  ;;  %v195_v18 = vld [vmem:[%s570_s1 + $0xb8] sm:$0xff] (!%p139_p2)  ;;  %v178_v21 = vld [vmem:[%s570_s1 + $0x30] sm:$0xff] (!%p139_p2) }
   0xb   : > { %382 = vmatprep.subr.bf16.mxu0 (!%p139_p2), %v381_v8  ;;  %v387_v19 = vpack.c.bf16 (!%p139_p2), %v177_v16, %v176_v15  ;;  %v389_v20 = vpack.c.bf16 (!%p139_p2), %v195_v18, %v194_v17  ;;  %v179_v22 = vld [vmem:[%s570_s1 + $0x38] sm:$0xff] (!%p139_p2)  ;;  %v196_v23 = vld [vmem:[%s570_s1 + $0xc0] sm:$0xff] (!%p139_p2)  ;;  %v197_v24 = vld [vmem:[%s570_s1 + $0xc8] sm:$0xff] (!%p139_p2) }
   0xc   : > { %v391_v26 = vpack.c.bf16 (!%p139_p2), %v179_v22, %v178_v21  ;;  %v393_v27 = vpack.c.bf16 (!%p139_p2), %v197_v24, %v196_v23  ;;  %v180_v28 = vld [vmem:[%s570_s1 + $0x40] sm:$0xff] (!%p139_p2)  ;;  %v181_v29 = vld [vmem:[%s570_s1 + $0x48] sm:$0xff] (!%p139_p2)  ;;  %v198_v30 = vld [vmem:[%s570_s1 + $0xd0] sm:$0xff] (!%p139_p2)  ;;  %v205_v51 = vstv (!%p139_p2), %s204_s5 }
   0xd   : > { %v199_v31 = vld [vmem:[%s570_s1 + $0xd8] sm:$0xff] (!%p139_p2)  ;;  %v395_v32 = vpack.c.bf16 (!%p139_p2), %v181_v29, %v180_v28  ;;  %v182_v34 = vld [vmem:[%s570_s1 + $0x50] sm:$0xff] (!%p139_p2)  ;;  %v200_v36 = vld [vmem:[%s570_s1 + $0xe0] sm:$0xff] (!%p139_p2) }
   0xe   : > { %s574_s15 = smov (!%p161_p3, %s331_s15), 1  ;;  %384 = vmatpush3.bf16.msra.mxu0 %v383_v13  ;;  %v397_v33 = vpack.c.bf16 %v199_v31, %v198_v30  ;;  %v183_v35 = vld [vmem:[%s570_s1 + $0x58] sm:$0xff]  ;;  %v201_v37 = vld [vmem:[%s570_s1 + $0xe8] sm:$0xff]  ;;  %v184_v40 = vld [vmem:[%s570_s1 + $0x60] sm:$0xff] }
   0xf   : > { %s341_s8 = sshll.u32 %s574_s15, 4  ;;  %386 = vmatprep.subr.bf16.mxu0 %v385_v14  ;;  %v399_v38 = vpack.c.bf16 %v183_v35, %v182_v34  ;;  %v401_v39 = vpack.c.bf16 %v201_v37, %v200_v36  ;;  %v185_v41 = vld [vmem:[%s570_s1 + $0x68] sm:$0xff]  ;;  %v202_v42 = vld [vmem:[%s570_s1 + $0xf0] sm:$0xff]  ;;  %v203_v43 = vld [vmem:[%s570_s1 + $0xf8] sm:$0xff]  ;;  %s338_s6 = sshll.u32 %s574_s15, 3 }
  0x10   : > { %s504_s20 = scalar_lea.vmem %s571_s2, %s341_s8  ;;  %v403_v44 = vpack.c.bf16 %v185_v41, %v184_v40  ;;  %v405_v45 = vpack.c.bf16 %v203_v43, %v202_v42  ;;  %v186_v46 = vld [vmem:[%s570_s1 + $0x70] sm:$0xff]  ;;  %v187_v47 = vld [vmem:[%s570_s1 + $0x78] sm:$0xff]  ;;  %s169_s9 = scalar_lea.vmem %s572_s3, %s338_s6 }
  0x11   : > { %v171_v25 = vld [vmem:[%s504_s20 + $0x8] sm:$0xff]  ;;  %v407_v48 = vpack.c.bf16 %v187_v47, %v186_v46  ;;  %v170_v49 = vld [vmem:[%s504_s20] sm:$0xff] }
  0x12   : > { %270 = vmatprep.mubr.f32.mxu0 %v171_v25  ;;  %388 = vmatpush3.bf16.msra.mxu0 %v387_v19 }
  0x13   : > { %390 = vmatprep.subr.bf16.mxu0 %v389_v20 }
  0x16   : > { %392 = vmatpush3.bf16.msra.mxu0 %v391_v26 }
  0x17   : > { %394 = vmatprep.subr.bf16.mxu0 %v393_v27 }
  0x1a   : > { %396 = vmatpush3.bf16.msra.mxu0 %v395_v32 }
  0x1b   : > { %398 = vmatprep.subr.bf16.mxu0 %v397_v33 }
  0x1e   : > { %400 = vmatpush3.bf16.msra.mxu0 %v399_v38 }
  0x1f   : > { %402 = vmatprep.subr.bf16.mxu0 %v401_v39 }
  0x22   : > { %404 = vmatpush3.bf16.msra.mxu0 %v403_v44 }
  0x23   : > { %406 = vmatprep.subr.bf16.mxu0 %v405_v45 }
  0x26   : > { %408 = vmatpush3.bf16.msra.mxu0 %v407_v48 }
  0x29   : > { %271 = vmatmul.mubr.f32.vlgmr.msra.gmra.mrb[0].mxu0 %v170_v49 }
  0xfc   : > { %v374_v50 = vpop.f32.mrb[0].mxu0 }
  0xfd   : > { %v375_v52 = vpop.f32.mrb[1].mxu0 }
  0xfe   : > { %v376_v53 = vadd.f32 %v375_v52, %v374_v50 }
 0x100   : > { %v273_v54 = vadd.f32 %v376_v53, %v205_v51 }
 0x102   : > { %277 = vst.msk [vmem:[%s169_s9] sm:$0xff] %vm276_vm0, %v273_v54 }
 0x103 PF: > { %s14_s14 = sadd.s32 1, %s423_s14  }
 0x104   : > { %p11_p4 = scmp.ge.s32.totalorder %s14_s14, 4  }
 0x106   :  { %13 = sbr.rel (!%p11_p4) target bundleno = 2 (0x2), region = 62 }

</bundles_post_ra>
